<compile_context>
chip_gen: v7x
topology: tpu7x:2x2x1
jax: 0.10.0
libtpu: 0.0.40
codegen_flags: <defaults>
</compile_context>

<pallas_src>
import functools
import math

import jax
import jax.numpy as jnp
from jax import lax
from jax.experimental import pallas as pl
from jax.experimental.pallas import tpu as pltpu


# --------------------------------------------------------------------------- #
# Kernel
# --------------------------------------------------------------------------- #
def _conv_lrelu_kernel(x_ref, w_ref, b_ref, o_ref, *, kernel_size, dilation,
                       w_padded, m_tile, negative_slope):
    """One (batch, row-tile) step of the fused conv + bias + LeakyReLU.

    x_ref: (1, 1, Cin, T_in*Wp)  flattened replicate-padded row tile (compute dtype)
    w_ref: (K*K, Cout, Cin)      per-tap weight matrices (compute dtype)
    b_ref: (Cout, 1)             bias (f32)
    o_ref: (1, Cout, T_out*Wp)   lane-dense output tile (out dtype)
    """
    K, d, Wp, MT = kernel_size, dilation, w_padded, m_tile

    acc = None
    for ky in range(K):
        for kx in range(K):
            off = (ky * Wp + kx) * d                     # static lane offset
            rhs = x_ref[0, 0, :, off:off + MT]           # (Cin, MT)
            part = lax.dot_general(
                w_ref[ky * K + kx], rhs,
                dimension_numbers=(((1,), (0,)), ((), ())),
                preferred_element_type=jnp.float32)      # (Cout, MT) f32 acc
            acc = part if acc is None else acc + part

    y = acc + b_ref[...]                                 # (Cout, 1) broadcast
    y = jnp.where(y >= 0, y, y * negative_slope)         # LeakyReLU (f32)
    o_ref[0] = y.astype(o_ref.dtype)                     # single cast at store


# --------------------------------------------------------------------------- #
# Wrapper
# --------------------------------------------------------------------------- #
def _tpu_vmem_capacity_bytes():
    try:
        return int(pltpu.get_tpu_info().vmem_capacity_bytes)
    except Exception:
        return 64 * 1024 * 1024      # conservative (v7x-sized) fallback


def _choose_row_tile(h_out, wp, vmem_cap_bytes):
    """Pick T_out so the per-step output tile is ~32K lanes on 64 MiB parts
    (v7x) and ~64K lanes on 128 MiB parts (v5e/v6e), with T_out*Wp % 128 == 0."""
    target = 65536 if vmem_cap_bytes > (96 << 20) else 32768
    if h_out * wp <= 2 * target:
        return h_out                                   # single tile (block == full dim)
    step = 128 // math.gcd(wp, 128)                    # keeps T_out*Wp a multiple of 128
    return max(step, ((target // wp) // step) * step)


@functools.partial(jax.jit, static_argnames=(
    "kernel_size", "dilation", "negative_slope", "compute_dtype", "out_dtype",
    "row_tile"))
def conv2d_dsin_forward(x_nchw, weight, bias, *, kernel_size, dilation,
                        negative_slope, compute_dtype=jnp.bfloat16,
                        out_dtype=jnp.bfloat16, row_tile=None):
    """x_nchw: (N, Cin, H, W); weight: (Cout, Cin, K, K); bias: (Cout,).

    Returns (N, Cout, H_out, W_out) in NCHW, matching the PyTorch module
    (pass out_dtype=jnp.float32 / compute_dtype=jnp.float32 for full precision).
    """
    N, Cin, H, W = x_nchw.shape
    Cout = weight.shape[0]
    K, d = kernel_size, dilation

    Wp = W + 2 * d
    H_out = H + 2 * d - d * (K - 1)
    W_out = W + 2 * d - d * (K - 1)
    if (K - 1) * d > Wp:
        raise ValueError("dilated kernel footprint wider than padded image")

    vmem_cap = _tpu_vmem_capacity_bytes()
    if row_tile is None:
        T_out = _choose_row_tile(H_out, Wp, vmem_cap)
        H_tiles = -(-H_out // T_out)
        if H_tiles == 1:
            T_out = H_out
    else:
        T_out = int(row_tile)
        H_tiles = -(-H_out // T_out)
    MT = T_out * Wp
    if H_tiles > 1 and MT % 128 != 0:
        raise ValueError(f"row_tile*Wp={MT} must be a multiple of 128 when tiled")

    halo = d * (K - 1) + (1 if K > 1 else 0)     # +1 row = flatten-tail slack
    T_in = T_out + halo
    L_in = T_in * Wp

    # ONE clamped-gather pass: replicate padding (rows & cols), per-tile halo
    # rows and the tail slack -> (N, H_tiles, Cin, T_in*Wp) in compute dtype.
    row_idx = jnp.clip((jnp.arange(H_tiles) * T_out)[:, None]
                       + jnp.arange(T_in)[None, :] - d, 0, H - 1)   # (Ht, T_in)
    col_idx = jnp.clip(jnp.arange(Wp) - d, 0, W - 1)                # (Wp,)
    xg = x_nchw[:, :, row_idx, :][..., col_idx]      # (N, Cin, Ht, T_in, Wp)
    xt = jnp.transpose(xg, (0, 2, 1, 3, 4)).reshape(N, H_tiles, Cin, L_in)
    xt = xt.astype(compute_dtype)

    # (Cout, Cin, K, K) -> (K*K, Cout, Cin); tap t = ky*K + kx.
    wt = jnp.transpose(weight, (2, 3, 0, 1)).reshape(K * K, Cout, Cin)
    wt = wt.astype(compute_dtype)
    bcol = bias.reshape(Cout, 1).astype(jnp.float32)

    kernel = functools.partial(
        _conv_lrelu_kernel, kernel_size=K, dilation=d, w_padded=Wp, m_tile=MT,
        negative_slope=negative_slope)

    out_flat = pl.pallas_call(
        kernel,
        out_shape=jax.ShapeDtypeStruct((N, Cout, H_tiles * MT), out_dtype),
        grid_spec=pltpu.PrefetchScalarGridSpec(
            num_scalar_prefetch=0,
            grid=(N, H_tiles),
            in_specs=[
                pl.BlockSpec((1, 1, Cin, L_in), lambda n, h: (n, h, 0, 0)),
                pl.BlockSpec((K * K, Cout, Cin), lambda n, h: (0, 0, 0)),
                pl.BlockSpec((Cout, 1), lambda n, h: (0, 0)),
            ],
            out_specs=pl.BlockSpec((1, Cout, MT), lambda n, h: (n, 0, h)),
        ),
        compiler_params=pltpu.CompilerParams(
            dimension_semantics=("parallel", "parallel"),
            vmem_limit_bytes=min(vmem_cap * 3 // 4, 100 * 1024 * 1024)),
    )(xt, wt, bcol)

    # Drop the padded-width don't-care columns (and any extra tiled rows) -> NCHW.
    out = out_flat.reshape(N, Cout, H_tiles * T_out, Wp)[:, :, :H_out, :W_out]
    return out


# --------------------------------------------------------------------------- #
# Init + reference
# --------------------------------------------------------------------------- #
def init_params(key, in_channels, out_channels, kernel_size, negative_slope):
    """Deterministic init mirroring the module's _weight_init.

    Conv weight: kaiming_uniform_(a=negative_slope, mode='fan_in',
    nonlinearity='leaky_relu').  Bias: PyTorch Conv2d default
    U(-1/sqrt(fan_in), 1/sqrt(fan_in)).
    """
    kw, kb = jax.random.split(key)
    fan_in = in_channels * kernel_size * kernel_size
    gain = jnp.sqrt(2.0 / (1.0 + negative_slope ** 2))
    bound_w = gain * jnp.sqrt(3.0 / fan_in)
    weight = jax.random.uniform(
        kw, (out_channels, in_channels, kernel_size, kernel_size),
        dtype=jnp.float32, minval=-bound_w, maxval=bound_w)
    bound_b = 1.0 / jnp.sqrt(fan_in)
    bias = jax.random.uniform(
        kb, (out_channels,), dtype=jnp.float32, minval=-bound_b, maxval=bound_b)
    return weight, bias


def _reference(x_nchw, weight, bias, *, kernel_size, dilation, negative_slope,
               compute_dtype=jnp.float32):
    """Pure-JAX reference (replicate pad + dilated VALID conv + LeakyReLU).

    Inputs are rounded to `compute_dtype` first to mirror the kernel's bf16
    operands (accumulation stays f32 in both paths)."""
    d = dilation
    xq = x_nchw.astype(compute_dtype).astype(jnp.float32)
    wq = weight.astype(compute_dtype).astype(jnp.float32)
    x_pad = jnp.pad(xq, ((0, 0), (0, 0), (d, d), (d, d)), mode="edge")
    y = lax.conv_general_dilated(
        x_pad, wq, window_strides=(1, 1), padding="VALID",
        rhs_dilation=(d, d),
        dimension_numbers=("NCHW", "OIHW", "NCHW"),
        preferred_element_type=jnp.float32)
    y = y + bias[None, :, None, None]
    return jnp.where(y >= 0, y, y * negative_slope)


# --------------------------------------------------------------------------- #
# Smoke test
# --------------------------------------------------------------------------- #
if __name__ == "__main__":
    # Shapes consistent with the module: N=2, Cin=4, Cout=8, 16x16 spatial.
    N, Cin, Cout, H, W = 2, 4, 8, 16, 16
    kernel_size, dilation, negative_slope = 3, 1, 0.2

    key = jax.random.PRNGKey(0)
    kx1, kx2, kp = jax.random.split(key, 3)
    x = jax.random.normal(kx1, (N, Cin, H, W), dtype=jnp.float32)
    weight, bias = init_params(kp, Cin, Cout, kernel_size, negative_slope)

    # bf16 operands + bf16 output (the perf-preferred path) -> compare at a
    # bf16-ulp-scale tolerance against an f32-accumulated reference.
    out = conv2d_dsin_forward(
        x, weight, bias,
        kernel_size=kernel_size, dilation=dilation,
        negative_slope=negative_slope)
    out = jax.block_until_ready(out)

    ref = _reference(
        x, weight, bias,
        kernel_size=kernel_size, dilation=dilation,
        negative_slope=negative_slope, compute_dtype=jnp.bfloat16)

    assert out.shape == (N, Cout, H, W)
    out_f32 = out.astype(jnp.float32)
    max_err = float(jnp.max(jnp.abs(out_f32 - ref)))
    assert jnp.allclose(out_f32, ref, atol=2e-2, rtol=2e-2), max_err

    # Second (still small) case exercising the multi-row-tile grid path:
    # W=126 -> Wp=128, row_tile=8 -> grid=(2, 2), tile width 8*128=1024 lanes.
    H2, W2 = 16, 126
    x2 = jax.random.normal(kx2, (N, Cin, H2, W2), dtype=jnp.float32)
    out2 = conv2d_dsin_forward(
        x2, weight, bias,
        kernel_size=kernel_size, dilation=dilation,
        negative_slope=negative_slope, row_tile=8)
    out2 = jax.block_until_ready(out2)
    ref2 = _reference(
        x2, weight, bias,
        kernel_size=kernel_size, dilation=dilation,
        negative_slope=negative_slope, compute_dtype=jnp.bfloat16)
    assert out2.shape == (N, Cout, H2, W2)
    out2_f32 = out2.astype(jnp.float32)
    max_err2 = float(jnp.max(jnp.abs(out2_f32 - ref2)))
    assert jnp.allclose(out2_f32, ref2, atol=2e-2, rtol=2e-2), max_err2

    print("KERNEL_OK")
</pallas_src>

<mosaic_0001>
module attributes {stable_mosaic.version = 11 : i64} {
  func.func @_conv_lrelu_kernel(%arg0: i32, %arg1: i32, %arg2: memref<1x1x4x342xbf16, #tpu.memory_space<vmem>>, %arg3: memref<9x8x4xbf16, #tpu.memory_space<vmem>>, %arg4: memref<8x1xf32, #tpu.memory_space<vmem>>, %arg5: memref<1x8x288xbf16, #tpu.memory_space<vmem>>) attributes {dimension_semantics = [#tpu.dimension_semantics<parallel>, #tpu.dimension_semantics<parallel>], iteration_bounds = array<i64: 2, 1>, scalar_prefetch = 0 : i64, scratch_operands = 0 : i64, tpu.core_type = #tpu.core_type<tc>, window_params = [{transform_indices = @transform_0, window_bounds = array<i64: 1, 1, 4, 342>}, {pipeline_mode = #tpu.pipeline_mode<synchronous>, transform_indices = @transform_1, window_bounds = array<i64: 9, 8, 4>}, {pipeline_mode = #tpu.pipeline_mode<synchronous>, transform_indices = @transform_2, window_bounds = array<i64: 8, 1>}, {transform_indices = @transform_3, window_bounds = array<i64: 1, 8, 288>}]} {
    %c0 = arith.constant 0 : index
    %c0_0 = arith.constant 0 : index
    %c0_1 = arith.constant 0 : index
    %c0_2 = arith.constant 0 : index
    %0 = vector.load %arg2[%c0, %c0_0, %c0_1, %c0_2] : memref<1x1x4x342xbf16, #tpu.memory_space<vmem>>, vector<1x1x4x288xbf16>
    %1 = vector.shape_cast %0 : vector<1x1x4x288xbf16> to vector<4x288xbf16>
    %c0_3 = arith.constant 0 : index
    %c0_4 = arith.constant 0 : index
    %c0_5 = arith.constant 0 : index
    %2 = vector.load %arg3[%c0_3, %c0_4, %c0_5] : memref<9x8x4xbf16, #tpu.memory_space<vmem>>, vector<1x8x4xbf16>
    %3 = vector.shape_cast %2 : vector<1x8x4xbf16> to vector<8x4xbf16>
    %cst = arith.constant dense<0.000000e+00> : vector<8x288xf32>
    %4 = tpu.matmul %3, %1, %cst {dimension_numbers = #tpu.dot_dimension_numbers<[1], [0], [0], [1], [0, 0, 1, 1], [], []>} : vector<8x4xbf16>, vector<4x288xbf16>, vector<8x288xf32> -> vector<8x288xf32>
    %c0_6 = arith.constant 0 : index
    %c0_7 = arith.constant 0 : index
    %c0_8 = arith.constant 0 : index
    %c1 = arith.constant 1 : index
    %5 = vector.load %arg2[%c0_6, %c0_7, %c0_8, %c1] : memref<1x1x4x342xbf16, #tpu.memory_space<vmem>>, vector<1x1x4x288xbf16>
    %6 = vector.shape_cast %5 : vector<1x1x4x288xbf16> to vector<4x288xbf16>
    %c1_9 = arith.constant 1 : index
    %c0_10 = arith.constant 0 : index
    %c0_11 = arith.constant 0 : index
    %7 = vector.load %arg3[%c1_9, %c0_10, %c0_11] : memref<9x8x4xbf16, #tpu.memory_space<vmem>>, vector<1x8x4xbf16>
    %8 = vector.shape_cast %7 : vector<1x8x4xbf16> to vector<8x4xbf16>
    %cst_12 = arith.constant dense<0.000000e+00> : vector<8x288xf32>
    %9 = tpu.matmul %8, %6, %cst_12 {dimension_numbers = #tpu.dot_dimension_numbers<[1], [0], [0], [1], [0, 0, 1, 1], [], []>} : vector<8x4xbf16>, vector<4x288xbf16>, vector<8x288xf32> -> vector<8x288xf32>
    %10 = arith.addf %4, %9 : vector<8x288xf32>
    %c0_13 = arith.constant 0 : index
    %c0_14 = arith.constant 0 : index
    %c0_15 = arith.constant 0 : index
    %c2 = arith.constant 2 : index
    %11 = vector.load %arg2[%c0_13, %c0_14, %c0_15, %c2] : memref<1x1x4x342xbf16, #tpu.memory_space<vmem>>, vector<1x1x4x288xbf16>
    %12 = vector.shape_cast %11 : vector<1x1x4x288xbf16> to vector<4x288xbf16>
    %c2_16 = arith.constant 2 : index
    %c0_17 = arith.constant 0 : index
    %c0_18 = arith.constant 0 : index
    %13 = vector.load %arg3[%c2_16, %c0_17, %c0_18] : memref<9x8x4xbf16, #tpu.memory_space<vmem>>, vector<1x8x4xbf16>
    %14 = vector.shape_cast %13 : vector<1x8x4xbf16> to vector<8x4xbf16>
    %cst_19 = arith.constant dense<0.000000e+00> : vector<8x288xf32>
    %15 = tpu.matmul %14, %12, %cst_19 {dimension_numbers = #tpu.dot_dimension_numbers<[1], [0], [0], [1], [0, 0, 1, 1], [], []>} : vector<8x4xbf16>, vector<4x288xbf16>, vector<8x288xf32> -> vector<8x288xf32>
    %16 = arith.addf %10, %15 : vector<8x288xf32>
    %c0_20 = arith.constant 0 : index
    %c0_21 = arith.constant 0 : index
    %c0_22 = arith.constant 0 : index
    %c18 = arith.constant 18 : index
    %17 = vector.load %arg2[%c0_20, %c0_21, %c0_22, %c18] : memref<1x1x4x342xbf16, #tpu.memory_space<vmem>>, vector<1x1x4x288xbf16>
    %18 = vector.shape_cast %17 : vector<1x1x4x288xbf16> to vector<4x288xbf16>
    %c3 = arith.constant 3 : index
    %c0_23 = arith.constant 0 : index
    %c0_24 = arith.constant 0 : index
    %19 = vector.load %arg3[%c3, %c0_23, %c0_24] : memref<9x8x4xbf16, #tpu.memory_space<vmem>>, vector<1x8x4xbf16>
    %20 = vector.shape_cast %19 : vector<1x8x4xbf16> to vector<8x4xbf16>
    %cst_25 = arith.constant dense<0.000000e+00> : vector<8x288xf32>
    %21 = tpu.matmul %20, %18, %cst_25 {dimension_numbers = #tpu.dot_dimension_numbers<[1], [0], [0], [1], [0, 0, 1, 1], [], []>} : vector<8x4xbf16>, vector<4x288xbf16>, vector<8x288xf32> -> vector<8x288xf32>
    %22 = arith.addf %16, %21 : vector<8x288xf32>
    %c0_26 = arith.constant 0 : index
    %c0_27 = arith.constant 0 : index
    %c0_28 = arith.constant 0 : index
    %c19 = arith.constant 19 : index
    %23 = vector.load %arg2[%c0_26, %c0_27, %c0_28, %c19] : memref<1x1x4x342xbf16, #tpu.memory_space<vmem>>, vector<1x1x4x288xbf16>
    %24 = vector.shape_cast %23 : vector<1x1x4x288xbf16> to vector<4x288xbf16>
    %c4 = arith.constant 4 : index
    %c0_29 = arith.constant 0 : index
    %c0_30 = arith.constant 0 : index
    %25 = vector.load %arg3[%c4, %c0_29, %c0_30] : memref<9x8x4xbf16, #tpu.memory_space<vmem>>, vector<1x8x4xbf16>
    %26 = vector.shape_cast %25 : vector<1x8x4xbf16> to vector<8x4xbf16>
    %cst_31 = arith.constant dense<0.000000e+00> : vector<8x288xf32>
    %27 = tpu.matmul %26, %24, %cst_31 {dimension_numbers = #tpu.dot_dimension_numbers<[1], [0], [0], [1], [0, 0, 1, 1], [], []>} : vector<8x4xbf16>, vector<4x288xbf16>, vector<8x288xf32> -> vector<8x288xf32>
    %28 = arith.addf %22, %27 : vector<8x288xf32>
    %c0_32 = arith.constant 0 : index
    %c0_33 = arith.constant 0 : index
    %c0_34 = arith.constant 0 : index
    %c20 = arith.constant 20 : index
    %29 = vector.load %arg2[%c0_32, %c0_33, %c0_34, %c20] : memref<1x1x4x342xbf16, #tpu.memory_space<vmem>>, vector<1x1x4x288xbf16>
    %30 = vector.shape_cast %29 : vector<1x1x4x288xbf16> to vector<4x288xbf16>
    %c5 = arith.constant 5 : index
    %c0_35 = arith.constant 0 : index
    %c0_36 = arith.constant 0 : index
    %31 = vector.load %arg3[%c5, %c0_35, %c0_36] : memref<9x8x4xbf16, #tpu.memory_space<vmem>>, vector<1x8x4xbf16>
    %32 = vector.shape_cast %31 : vector<1x8x4xbf16> to vector<8x4xbf16>
    %cst_37 = arith.constant dense<0.000000e+00> : vector<8x288xf32>
    %33 = tpu.matmul %32, %30, %cst_37 {dimension_numbers = #tpu.dot_dimension_numbers<[1], [0], [0], [1], [0, 0, 1, 1], [], []>} : vector<8x4xbf16>, vector<4x288xbf16>, vector<8x288xf32> -> vector<8x288xf32>
    %34 = arith.addf %28, %33 : vector<8x288xf32>
    %c0_38 = arith.constant 0 : index
    %c0_39 = arith.constant 0 : index
    %c0_40 = arith.constant 0 : index
    %c36 = arith.constant 36 : index
    %35 = vector.load %arg2[%c0_38, %c0_39, %c0_40, %c36] : memref<1x1x4x342xbf16, #tpu.memory_space<vmem>>, vector<1x1x4x288xbf16>
    %36 = vector.shape_cast %35 : vector<1x1x4x288xbf16> to vector<4x288xbf16>
    %c6 = arith.constant 6 : index
    %c0_41 = arith.constant 0 : index
    %c0_42 = arith.constant 0 : index
    %37 = vector.load %arg3[%c6, %c0_41, %c0_42] : memref<9x8x4xbf16, #tpu.memory_space<vmem>>, vector<1x8x4xbf16>
    %38 = vector.shape_cast %37 : vector<1x8x4xbf16> to vector<8x4xbf16>
    %cst_43 = arith.constant dense<0.000000e+00> : vector<8x288xf32>
    %39 = tpu.matmul %38, %36, %cst_43 {dimension_numbers = #tpu.dot_dimension_numbers<[1], [0], [0], [1], [0, 0, 1, 1], [], []>} : vector<8x4xbf16>, vector<4x288xbf16>, vector<8x288xf32> -> vector<8x288xf32>
    %40 = arith.addf %34, %39 : vector<8x288xf32>
    %c0_44 = arith.constant 0 : index
    %c0_45 = arith.constant 0 : index
    %c0_46 = arith.constant 0 : index
    %c37 = arith.constant 37 : index
    %41 = vector.load %arg2[%c0_44, %c0_45, %c0_46, %c37] : memref<1x1x4x342xbf16, #tpu.memory_space<vmem>>, vector<1x1x4x288xbf16>
    %42 = vector.shape_cast %41 : vector<1x1x4x288xbf16> to vector<4x288xbf16>
    %c7 = arith.constant 7 : index
    %c0_47 = arith.constant 0 : index
    %c0_48 = arith.constant 0 : index
    %43 = vector.load %arg3[%c7, %c0_47, %c0_48] : memref<9x8x4xbf16, #tpu.memory_space<vmem>>, vector<1x8x4xbf16>
    %44 = vector.shape_cast %43 : vector<1x8x4xbf16> to vector<8x4xbf16>
    %cst_49 = arith.constant dense<0.000000e+00> : vector<8x288xf32>
    %45 = tpu.matmul %44, %42, %cst_49 {dimension_numbers = #tpu.dot_dimension_numbers<[1], [0], [0], [1], [0, 0, 1, 1], [], []>} : vector<8x4xbf16>, vector<4x288xbf16>, vector<8x288xf32> -> vector<8x288xf32>
    %46 = arith.addf %40, %45 : vector<8x288xf32>
    %c0_50 = arith.constant 0 : index
    %c0_51 = arith.constant 0 : index
    %c0_52 = arith.constant 0 : index
    %c38 = arith.constant 38 : index
    %47 = vector.load %arg2[%c0_50, %c0_51, %c0_52, %c38] : memref<1x1x4x342xbf16, #tpu.memory_space<vmem>>, vector<1x1x4x288xbf16>
    %48 = vector.shape_cast %47 : vector<1x1x4x288xbf16> to vector<4x288xbf16>
    %c8 = arith.constant 8 : index
    %c0_53 = arith.constant 0 : index
    %c0_54 = arith.constant 0 : index
    %49 = vector.load %arg3[%c8, %c0_53, %c0_54] : memref<9x8x4xbf16, #tpu.memory_space<vmem>>, vector<1x8x4xbf16>
    %50 = vector.shape_cast %49 : vector<1x8x4xbf16> to vector<8x4xbf16>
    %cst_55 = arith.constant dense<0.000000e+00> : vector<8x288xf32>
    %51 = tpu.matmul %50, %48, %cst_55 {dimension_numbers = #tpu.dot_dimension_numbers<[1], [0], [0], [1], [0, 0, 1, 1], [], []>} : vector<8x4xbf16>, vector<4x288xbf16>, vector<8x288xf32> -> vector<8x288xf32>
    %52 = arith.addf %46, %51 : vector<8x288xf32>
    %c0_56 = arith.constant 0 : index
    %c0_57 = arith.constant 0 : index
    %53 = vector.load %arg4[%c0_56, %c0_57] : memref<8x1xf32, #tpu.memory_space<vmem>>, vector<8x1xf32>
    %54 = vector.broadcast %53 : vector<8x1xf32> to vector<8x288xf32>
    %55 = arith.addf %52, %54 : vector<8x288xf32>
    %cst_58 = arith.constant 0.000000e+00 : f32
    %56 = vector.broadcast %cst_58 : f32 to vector<8x288xf32>
    %57 = arith.cmpf oge, %55, %56 : vector<8x288xf32>
    %cst_59 = arith.constant 2.000000e-01 : f32
    %58 = vector.broadcast %cst_59 : f32 to vector<8x288xf32>
    %59 = arith.mulf %55, %58 : vector<8x288xf32>
    %60 = arith.select %57, %55, %59 : vector<8x288xi1>, vector<8x288xf32>
    %61 = arith.truncf %60 : vector<8x288xf32> to vector<8x288xbf16>
    %c0_60 = arith.constant 0 : index
    %c0_61 = arith.constant 0 : index
    %c0_62 = arith.constant 0 : index
    %62 = vector.load %arg5[%c0_60, %c0_61, %c0_62] : memref<1x8x288xbf16, #tpu.memory_space<vmem>>, vector<1x8x288xbf16>
    %63 = vector.shape_cast %62 : vector<1x8x288xbf16> to vector<8x288xbf16>
    %64 = vector.shape_cast %61 : vector<8x288xbf16> to vector<1x8x288xbf16>
    tpu.vector_store %arg5[%c0_60, %c0_61, %c0_62], %64 {strides = array<i32>} : memref<1x8x288xbf16, #tpu.memory_space<vmem>>, vector<1x8x288xbf16>,
    return
  }
  func.func @transform_0(%arg0: i32, %arg1: i32) -> (i32, i32, i32, i32) {
    %c0_i32 = arith.constant 0 : i32
    %c0_i32_0 = arith.constant 0 : i32
    %c0_i32_1 = arith.constant 0 : i32
    return %arg0, %arg1, %c0_i32, %c0_i32_0 : i32, i32, i32, i32
  }
  func.func @transform_1(%arg0: i32, %arg1: i32) -> (i32, i32, i32) {
    %c0_i32 = arith.constant 0 : i32
    %c0_i32_0 = arith.constant 0 : i32
    %c0_i32_1 = arith.constant 0 : i32
    %c0_i32_2 = arith.constant 0 : i32
    return %c0_i32, %c0_i32_0, %c0_i32_1 : i32, i32, i32
  }
  func.func @transform_2(%arg0: i32, %arg1: i32) -> (i32, i32) {
    %c0_i32 = arith.constant 0 : i32
    %c0_i32_0 = arith.constant 0 : i32
    %c0_i32_1 = arith.constant 0 : i32
    return %c0_i32, %c0_i32_0 : i32, i32
  }
  func.func @transform_3(%arg0: i32, %arg1: i32) -> (i32, i32, i32) {
    %c0_i32 = arith.constant 0 : i32
    %c0_i32_0 = arith.constant 0 : i32
    return %arg0, %c0_i32, %arg1 : i32, i32, i32
  }
}

</mosaic_0001>

<bundles_post_ra>
// kernel: conv2d_dsin_forward.1
= control target key start
LH: loop header
LB: loop body
LE: loop exit
PB: predicated region body
PF: predicated region fallthrough
CT: control target
= control target key end

     0   :  { %s1649_s12 = smov 0   ;;  %s1651_s13 = smov 0   ;;  %s1842_s0 = inlined_call_operand.vmem [shape: bf16[2,1,4,342], index: 0, kind: input, shape index: {}]   ;;  %s1843_s1 = inlined_call_operand.vmem [shape: bf16[9,8,4], index: 1, kind: input, shape index: {}]   ;;  %s1844_s2 = inlined_call_operand.vmem [shape: f32[8,1], index: 2, kind: input, shape index: {}]   ;;  %s1845_s3 = inlined_call_operand.vmem [shape: bf16[2,8,288], index: 3, kind: output, shape index: {}]  }
   0x1   :  { %s1653_s14 = smov 0  }
   0x2 LB: > { %s25_s15 = sadd.s32 1, %s1611_s13  ;;  %p1430_p0 = scmp.ge.s32.totalorder %s1615_s14, 1  ;;  %s1615_s14 = sphi %s1653_s14, %s13_s14   ;;  %s1611_s13 = sphi %s1651_s13, %s1847_s13   ;;  %s1607_s12 = sphi %s1649_s12, %s1846_s12  }
   0x3   : > { %p27_p1 = scmp.ge.s32.totalorder %s25_s15, 2  ;;  %p157_p2 = scmp.lt.s32.totalorder %s1615_s14, 3 }
   0x5   : > { %s1849_s15 = smov (%p27_p1, %s25_s15), 0  ;;  %p158_p3 = pnand %p1430_p0, %p157_p2 }
   0x6   : > { %p189_p4 = scmp.lt.s32.totalorder (!%p158_p3), %s1607_s12, 1  ;;  %v218_v0 = vlaneseq (!%p158_p3)  ;;  %v1617_v1 = vmov (!%p158_p3), 1983009808   ;;  %v1618_v3 = vmov (!%p158_p3), 0.0   ;;  %vm1619_vm0 = vmmov (!%p158_p3), 0   ;;  %s1621_s20 = smov (!%p158_p3), 127  }
   0x7   : > { %161 = sbr.rel (%p158_p3) target bundleno = 432 (0x1b0), region = 32  ;;  %v216_v2 = vunpack.c.l.s4 (!%p158_p3), %v1617_v1  ;;  %1492 = vmatprep.subr.bf16.mxu1 (!%p158_p3), %v1618_v3  ;;  %1494 = vmatprep.mubr.msk.bf16.mxu1 (!%p158_p3), %vm1619_vm0, %v1618_v3  ;;  %v1620_v6 = vmov (!%p158_p3), 0   ;;  %s1622_s21 = smov (!%p158_p3), 126   ;;  %v1302_v48 = vld [vmem:[%s1844_s2] sm:$0xff] (!%p158_p3)  ;;  %vm243_vm1 = vcmask (!%p158_p3), 1041408   ;;  %vm236_vm2 = vcmask (!%p158_p3), 1039360  }
   0x8   : > { %v219_v4 = vshrl.u32 (!%p158_p3), %v218_v0, 7  ;;  %285 = vmatprep.mubr.bf16.mxu0 (!%p158_p3), %v1620_v6  ;;  %1584 = vset.pattern.permute.xlu0 (!%p158_p3), %v1620_v6  ;;  %s1623_s22 = smov (!%p158_p3), 110   ;;  %s1624_s23 = smov (!%p158_p3), 109   ;;  %v1433_v53 = vld [vmem:[%s1843_s1 + $0x4] sm:$0xf] (!%p158_p3)  ;;  %vm239_vm3 = vcmask (!%p158_p3), 31744  }
   0x9   : > { %v217_v5 = vunpack.c.0.s8 (!%p158_p3), %v216_v2  ;;  %s1625_s24 = smov (!%p158_p3), 108   ;;  %s1626_s25 = smov (!%p158_p3), 92   ;;  %vm453_vm4 = vcmask (!%p158_p3), 1031168   ;;  %v210_v63 = vld [vmem:[%s1843_s1] sm:$0xf] (!%p158_p3)  ;;  %vm578_vm5 = vcmask (!%p158_p3), 900096  }
   0xa   : > { %s1627_s26 = smov (!%p158_p3), 91   ;;  %s1628_s27 = smov (!%p158_p3), 90   ;;  %vm703_vm6 = vcmask (!%p158_p3), 891904   ;;  %vm828_vm7 = vcmask (!%p158_p3), 883712   ;;  %vm953_vm8 = vcmask (!%p158_p3), 752640   ;;  %vm1078_vm9 = vcmask (!%p158_p3), 744448  }
   0xb   : > { %v1675_v7 = vsub.s32 (!%p158_p3), %v217_v5, %v219_v4  ;;  %vm1203_vm10 = vcmask (!%p158_p3), 736256   ;;  %vm1334_vm12 = vcmask (!%p158_p3), 257024  }
   0xe   : > { %s1851_s12 = smov (!%p189_p4, %s1607_s12), 1 }
   0xf   : > { %s1546_s16 = smul.u32 6, %s1851_s12 }
  0x11   : > { %s1680_s19 = scalar_lea.vmem %s1842_s0, %s1546_s16 }
  0x12   : > { %v209_v8 = vld [vmem:[%s1680_s19] sm:$0x3f] }
  0x13   : > { %v1684_v9 = vrot.slane %v209_v8, %v1675_v7  ;;  %v214_v10 = vcombine.high %v209_v8, %v209_v8  ;;  %v427_v11 = vld [vmem:[%s1680_s19] sm:$0x3f] }
  0x14   : > { %v438_v14 = vrot.slane %v427_v11, %v1675_v7  ;;  %v431_v15 = vcombine.high %v427_v11, %v427_v11  ;;  %v552_v17 = vld [vmem:[%s1680_s19] sm:$0x3f] }
  0x15   : > { %230 = vrot.lane.b32.xlu0 %v1684_v9, %s1621_s20  ;;  %v1689_v12 = vrot.slane %v214_v10, %v1675_v7  ;;  %v1693_v13 = vcombine.high %v1684_v9, %v1684_v9  ;;  %v563_v19 = vrot.slane %v552_v17, %v1675_v7  ;;  %v556_v20 = vcombine.high %v552_v17, %v552_v17  ;;  %v677_v22 = vld [vmem:[%s1680_s19] sm:$0x3f]  ;;  %v1440_v10 = vld [vmem:[%s1843_s1 + $0x8] sm:$0xf] }
  0x16   : > { %v446_v16 = vcombine.high %v438_v14, %v438_v14  ;;  %v445_v18 = vrot.slane %v431_v15, %v1675_v7  ;;  %v688_v24 = vrot.slane %v677_v22, %v1675_v7  ;;  %v681_v25 = vcombine.high %v677_v22, %v677_v22  ;;  %v802_v27 = vld [vmem:[%s1680_s19] sm:$0x3f] }
  0x17   : > { %234 = vrot.lane.b32.xlu1 %v1689_v12, %s1621_s20  ;;  %v571_v21 = vcombine.high %v563_v19, %v563_v19  ;;  %v570_v23 = vrot.slane %v556_v20, %v1675_v7  ;;  %v813_v29 = vrot.slane %v802_v27, %v1675_v7  ;;  %v806_v30 = vcombine.high %v802_v27, %v802_v27  ;;  %v927_v32 = vld [vmem:[%s1680_s19] sm:$0x3f]  ;;  %v1448_v27 = vld [vmem:[%s1843_s1 + $0x10] sm:$0xf] }
  0x18   : > { %v696_v26 = vcombine.high %v688_v24, %v688_v24  ;;  %v695_v28 = vrot.slane %v681_v25, %v1675_v7  ;;  %v938_v34 = vrot.slane %v927_v32, %v1675_v7  ;;  %v931_v35 = vcombine.high %v927_v32, %v927_v32  ;;  %v1052_v37 = vld [vmem:[%s1680_s19] sm:$0x3f] }
  0x19   : > { %232 = vrot.lane.b32.xlu0 %v1693_v13, %s1621_s20  ;;  %v821_v31 = vcombine.high %v813_v29, %v813_v29  ;;  %v820_v33 = vrot.slane %v806_v30, %v1675_v7  ;;  %v1063_v39 = vrot.slane %v1052_v37, %v1675_v7  ;;  %v1056_v40 = vcombine.high %v1052_v37, %v1052_v37  ;;  %v1177_v42 = vld [vmem:[%s1680_s19] sm:$0x3f] }
  0x1a   : > { %v946_v36 = vcombine.high %v938_v34, %v938_v34  ;;  %v945_v38 = vrot.slane %v931_v35, %v1675_v7  ;;  %v1188_v44 = vrot.slane %v1177_v42, %v1675_v7  ;;  %v1181_v45 = vcombine.high %v1177_v42, %v1177_v42  ;;  %v1452_v35 = vld [vmem:[%s1843_s1 + $0x14] sm:$0xf]  ;;  %v1456_v42 = vld [vmem:[%s1843_s1 + $0x18] sm:$0xf] }
  0x1b   : > { %447 = vrot.lane.b32.xlu1 %v438_v14, %s1622_s21  ;;  %v1071_v41 = vcombine.high %v1063_v39, %v1063_v39  ;;  %v1070_v43 = vrot.slane %v1056_v40, %v1675_v7  ;;  %v344_v56 = vsel %vm243_vm1, %v1689_v12, 0  ;;  %v338_v59 = vsel %vm243_vm1, %v1684_v9, 0 }
  0x1c   : > { %v1196_v46 = vcombine.high %v1188_v44, %v1188_v44  ;;  %v1195_v47 = vrot.slane %v1181_v45, %v1675_v7 }
  0x1d   : > { %449 = vrot.lane.b32.xlu0 %v446_v16, %s1622_s21 }
  0x1f   : > { %451 = vrot.lane.b32.xlu1 %v445_v18, %s1622_s21 }
  0x21   : > { %572 = vrot.lane.b32.xlu0 %v563_v19, %s1623_s22  ;;  %v1444_v19 = vld [vmem:[%s1843_s1 + $0xc] sm:$0xf] }
  0x23   : > { %574 = vrot.lane.b32.xlu1 %v571_v21, %s1623_s22 }
  0x25   : > { %576 = vrot.lane.b32.xlu0 %v570_v23, %s1623_s22 }
  0x27   : > { %697 = vrot.lane.b32.xlu1 %v688_v24, %s1624_s23 }
  0x29   : > { %699 = vrot.lane.b32.xlu0 %v696_v26, %s1624_s23 }
  0x2b   : > { %701 = vrot.lane.b32.xlu1 %v695_v28, %s1624_s23 }
  0x2d   : > { %822 = vrot.lane.b32.xlu0 %v813_v29, %s1625_s24 }
  0x2f   : > { %824 = vrot.lane.b32.xlu1 %v821_v31, %s1625_s24 }
  0x31   : > { %826 = vrot.lane.b32.xlu0 %v820_v33, %s1625_s24 }
  0x33   : > { %947 = vrot.lane.b32.xlu1 %v938_v34, %s1626_s25 }
  0x35   : > { %949 = vrot.lane.b32.xlu0 %v946_v36, %s1626_s25 }
  0x37   : > { %951 = vrot.lane.b32.xlu1 %v945_v38, %s1626_s25  ;;  %s1547_s25 = smul.u32 12, %s1851_s12 }
  0x39   : > { %1072 = vrot.lane.b32.xlu0 %v1063_v39, %s1627_s26  ;;  %s206_s28 = scalar_lea.vmem %s1845_s3, %s1547_s25 }
  0x3b   : > { %1074 = vrot.lane.b32.xlu1 %v1071_v41, %s1627_s26 }
  0x3d   : > { %1076 = vrot.lane.b32.xlu0 %v1070_v43, %s1627_s26 }
  0x3f   : > { %1197 = vrot.lane.b32.xlu1 %v1188_v44, %s1628_s27 }
  0x41   : > { %1199 = vrot.lane.b32.xlu0 %v1196_v46, %s1628_s27 }
  0x43   : > { %1201 = vrot.lane.b32.xlu1 %v1195_v47, %s1628_s27 }
  0x45   : > { %1305 = vperm.xlu0 %1584, %v1302_v48  }
  0x87   : > { %v231_v49 = vpop.permute.xlu0 %230 }
  0x89   : > { %v235_v50 = vpop.permute.xlu1 %234 }
  0x8a   : > { %v251_v51 = vsel %vm243_vm1, %v235_v50, 0 }
  0x8b   : > { %v233_v52 = vpop.permute.xlu0 %232  ;;  %1493 = vmatpush3.bf16.msra.mxu1 %v251_v51 }
  0x8c   : > { %v238_v54 = vsel %vm236_vm2, %v233_v52, %v235_v50  ;;  %v237_v55 = vsel %vm236_vm2, %v231_v49, %v233_v52  ;;  %1498 = vmatprep.subr.bf16.mxu1 %v1618_v3  ;;  %v1460_v49 = vld [vmem:[%s1843_s1 + $0x1c] sm:$0xf] }
  0x8d   : > { %1434 = vmatprep.subr.msk.bf16.mxu0 %vm243_vm1, %v238_v54  ;;  %v245_v57 = vsel %vm243_vm1, %v237_v55, 0  ;;  %v448_v58 = vpop.permute.xlu1 %447 }
  0x8e   : > { %254 = vmatpush1.bf16.msra.mxu0 %v245_v57  ;;  %1495 = vmatmul.mubr.msk.bf16.vlgmr.msra.gmra.mrb[0].mxu1 %vm239_vm3, %v1433_v53 }
  0x8f   : > { %1437 = vmatprep.subr.msk.bf16.mxu0 %vm243_vm1, %v1693_v13  ;;  %v450_v60 = vpop.permute.xlu0 %449  ;;  %1499 = vmatpush3.bf16.msra.mxu1 %v344_v56 }
  0x90   : > { %1500 = vmatprep.mubr.msk.bf16.mxu1 %vm1619_vm0, %v1618_v3  ;;  %1504 = vmatprep.subr.bf16.mxu1 %v1618_v3  ;;  %v454_v1 = vsel %vm453_vm4, %v448_v58, %v450_v60 }
  0x91   : > { %1435 = vmatmul.mubr.msk.bf16.vlgmr.msra.gmra.mrb[0].mxu0 %vm239_vm3, %v1433_v53  ;;  %v452_v61 = vpop.permute.xlu1 %451  ;;  %v460_v5 = vsel %vm243_vm1, %v454_v1, 0  ;;  %v1464_v53 = vld [vmem:[%s1843_s1 + $0x20] sm:$0xf] }
  0x92   : > { %347 = vmatpush1.bf16.msra.mxu0 %v338_v59  ;;  %v455_v62 = vsel %vm453_vm4, %v450_v60, %v452_v61  ;;  %378 = vmatprep.mubr.bf16.mxu0 %v1620_v6  ;;  %v466_v2 = vsel %vm243_vm1, %v452_v61, 0 }
  0x93   : > { %1441 = vmatprep.subr.msk.bf16.mxu0 %vm243_vm1, %v455_v62  ;;  %v573_v0 = vpop.permute.xlu0 %572 }
  0x95   : > { %v575_v4 = vpop.permute.xlu1 %574 }
  0x96   : > { %1501 = vmatmul.mubr.msk.bf16.vlgmr.msra.gmra.mrb[4].mxu1 %vm239_vm3, %v210_v63  ;;  %v579_v12 = vsel %vm578_vm5, %v573_v0, %v575_v4 }
  0x97   : > { %1505 = vmatpush3.bf16.msra.mxu1 %v466_v2  ;;  %1506 = vmatprep.mubr.msk.bf16.mxu1 %vm1619_vm0, %v1618_v3  ;;  %v577_v7 = vpop.permute.xlu0 %576  ;;  %v585_v15 = vsel %vm243_vm1, %v579_v12, 0 }
  0x98   : > { %v580_v8 = vsel %vm578_vm5, %v575_v4, %v577_v7  ;;  %1510 = vmatprep.subr.bf16.mxu1 %v1618_v3  ;;  %v591_v13 = vsel %vm243_vm1, %v577_v7, 0 }
  0x99   : > { %1438 = vmatmul.mubr.msk.bf16.vlgmr.msra.gmra.mrb[4].mxu0 %vm239_vm3, %v210_v63  ;;  %v698_v9 = vpop.permute.xlu1 %697 }
  0x9a   : > { %469 = vmatpush1.bf16.msra.mxu0 %v460_v5  ;;  %500 = vmatprep.mubr.bf16.mxu0 %v1620_v6 }
  0x9b   : > { %1445 = vmatprep.subr.msk.bf16.mxu0 %vm243_vm1, %v580_v8  ;;  %v700_v11 = vpop.permute.xlu0 %699 }
  0x9c   : > { %v704_v20 = vsel %vm703_vm6, %v698_v9, %v700_v11 }
  0x9d   : > { %v702_v14 = vpop.permute.xlu1 %701  ;;  %v710_v23 = vsel %vm243_vm1, %v704_v20, 0 }
  0x9e   : > { %1507 = vmatmul.mubr.msk.bf16.vlgmr.msra.gmra.mrb[8].mxu1 %vm239_vm3, %v1440_v10  ;;  %v705_v17 = vsel %vm703_vm6, %v700_v11, %v702_v14  ;;  %v716_v21 = vsel %vm243_vm1, %v702_v14, 0 }
  0x9f   : > { %1511 = vmatpush3.bf16.msra.mxu1 %v591_v13  ;;  %1512 = vmatprep.mubr.msk.bf16.mxu1 %vm1619_vm0, %v1618_v3  ;;  %v823_v16 = vpop.permute.xlu0 %822 }
  0xa0   : > { %1516 = vmatprep.subr.bf16.mxu1 %v1618_v3 }
  0xa1   : > { %1442 = vmatmul.mubr.msk.bf16.vlgmr.msra.gmra.mrb[8].mxu0 %vm239_vm3, %v1440_v10  ;;  %v825_v18 = vpop.permute.xlu1 %824 }
  0xa2   : > { %594 = vmatpush1.bf16.msra.mxu0 %v585_v15  ;;  %625 = vmatprep.mubr.bf16.mxu0 %v1620_v6  ;;  %v829_v28 = vsel %vm828_vm7, %v823_v16, %v825_v18 }
  0xa3   : > { %1449 = vmatprep.subr.msk.bf16.mxu0 %vm243_vm1, %v705_v17  ;;  %v827_v22 = vpop.permute.xlu0 %826  ;;  %v835_v31 = vsel %vm243_vm1, %v829_v28, 0 }
  0xa4   : > { %v830_v25 = vsel %vm828_vm7, %v825_v18, %v827_v22  ;;  %v841_v29 = vsel %vm243_vm1, %v827_v22, 0 }
  0xa5   : > { %v948_v24 = vpop.permute.xlu1 %947 }
  0xa6   : > { %1513 = vmatmul.mubr.msk.bf16.vlgmr.msra.gmra.mrb[12].mxu1 %vm239_vm3, %v1444_v19 }
  0xa7   : > { %1517 = vmatpush3.bf16.msra.mxu1 %v716_v21  ;;  %1518 = vmatprep.mubr.msk.bf16.mxu1 %vm1619_vm0, %v1618_v3  ;;  %v950_v26 = vpop.permute.xlu0 %949 }
  0xa8   : > { %1522 = vmatprep.subr.bf16.mxu1 %v1618_v3  ;;  %v954_v36 = vsel %vm953_vm8, %v948_v24, %v950_v26 }
  0xa9   : > { %1446 = vmatmul.mubr.msk.bf16.vlgmr.msra.gmra.mrb[12].mxu0 %vm239_vm3, %v1444_v19  ;;  %v952_v30 = vpop.permute.xlu1 %951  ;;  %v960_v39 = vsel %vm243_vm1, %v954_v36, 0 }
  0xaa   : > { %719 = vmatpush1.bf16.msra.mxu0 %v710_v23  ;;  %750 = vmatprep.mubr.bf16.mxu0 %v1620_v6  ;;  %v955_v33 = vsel %vm953_vm8, %v950_v26, %v952_v30  ;;  %v966_v37 = vsel %vm243_vm1, %v952_v30, 0 }
  0xab   : > { %1453 = vmatprep.subr.msk.bf16.mxu0 %vm243_vm1, %v830_v25  ;;  %v1073_v32 = vpop.permute.xlu0 %1072 }
  0xad   : > { %v1075_v34 = vpop.permute.xlu1 %1074 }
  0xae   : > { %1519 = vmatmul.mubr.msk.bf16.vlgmr.msra.gmra.mrb[16].mxu1 %vm239_vm3, %v1448_v27  ;;  %v1079_v43 = vsel %vm1078_vm9, %v1073_v32, %v1075_v34 }
  0xaf   : > { %1523 = vmatpush3.bf16.msra.mxu1 %v841_v29  ;;  %1524 = vmatprep.mubr.msk.bf16.mxu1 %vm1619_vm0, %v1618_v3  ;;  %v1077_v38 = vpop.permute.xlu0 %1076  ;;  %v1085_v47 = vsel %vm243_vm1, %v1079_v43, 0 }
  0xb0   : > { %1528 = vmatprep.subr.bf16.mxu1 %v1618_v3  ;;  %v1080_v41 = vsel %vm1078_vm9, %v1075_v34, %v1077_v38  ;;  %v1091_v44 = vsel %vm243_vm1, %v1077_v38, 0 }
  0xb1   : > { %1450 = vmatmul.mubr.msk.bf16.vlgmr.msra.gmra.mrb[16].mxu0 %vm239_vm3, %v1448_v27  ;;  %v1198_v40 = vpop.permute.xlu1 %1197 }
  0xb2   : > { %844 = vmatpush1.bf16.msra.mxu0 %v835_v31  ;;  %875 = vmatprep.mubr.bf16.mxu0 %v1620_v6 }
  0xb3   : > { %1457 = vmatprep.subr.msk.bf16.mxu0 %vm243_vm1, %v955_v33  ;;  %v1200_v45 = vpop.permute.xlu0 %1199 }
  0xb4   : > { %v1204_v50 = vsel %vm1203_vm10, %v1198_v40, %v1200_v45 }
  0xb5   : > { %v1202_v46 = vpop.permute.xlu1 %1201  ;;  %v1210_v52 = vsel %vm243_vm1, %v1204_v50, 0 }
  0xb6   : > { %1525 = vmatmul.mubr.msk.bf16.vlgmr.msra.gmra.mrb[20].mxu1 %vm239_vm3, %v1452_v35  ;;  %v1205_v48 = vsel %vm1203_vm10, %v1200_v45, %v1202_v46  ;;  %v1216_v51 = vsel %vm243_vm1, %v1202_v46, 0 }
  0xb7   : > { %1529 = vmatpush3.bf16.msra.mxu1 %v966_v37  ;;  %1530 = vmatprep.mubr.msk.bf16.mxu1 %vm1619_vm0, %v1618_v3 }
  0xb8   : > { %1534 = vmatprep.subr.bf16.mxu1 %v1618_v3 }
  0xb9   : > { %1454 = vmatmul.mubr.msk.bf16.vlgmr.msra.gmra.mrb[20].mxu0 %vm239_vm3, %v1452_v35 }
  0xba   : > { %969 = vmatpush1.bf16.msra.mxu0 %v960_v39  ;;  %1000 = vmatprep.mubr.bf16.mxu0 %v1620_v6 }
  0xbb   : > { %1461 = vmatprep.subr.msk.bf16.mxu0 %vm243_vm1, %v1080_v41 }
  0xbe   : > { %1531 = vmatmul.mubr.msk.bf16.vlgmr.msra.gmra.mrb[24].mxu1 %vm239_vm3, %v1456_v42 }
  0xbf   : > { %1535 = vmatpush3.bf16.msra.mxu1 %v1091_v44  ;;  %1536 = vmatprep.mubr.msk.bf16.mxu1 %vm1619_vm0, %v1618_v3 }
  0xc0   : > { %1540 = vmatprep.subr.bf16.mxu1 %v1618_v3 }
  0xc1   : > { %1458 = vmatmul.mubr.msk.bf16.vlgmr.msra.gmra.mrb[24].mxu0 %vm239_vm3, %v1456_v42 }
  0xc2   : > { %1094 = vmatpush1.bf16.msra.mxu0 %v1085_v47  ;;  %1125 = vmatprep.mubr.bf16.mxu0 %v1620_v6 }
  0xc3   : > { %1465 = vmatprep.subr.msk.bf16.mxu0 %vm243_vm1, %v1205_v48 }
  0xc6   : > { %1537 = vmatmul.mubr.msk.bf16.vlgmr.msra.gmra.mrb[28].mxu1 %vm239_vm3, %v1460_v49 }
  0xc7   : > { %1541 = vmatpush3.bf16.msra.mxu1 %v1216_v51  ;;  %1542 = vmatprep.mubr.msk.bf16.mxu1 %vm1619_vm0, %v1618_v3 }
  0xc9   : > { %1462 = vmatmul.mubr.msk.bf16.vlgmr.msra.gmra.mrb[28].mxu0 %vm239_vm3, %v1460_v49 }
  0xca   : > { %1219 = vmatpush1.bf16.msra.mxu0 %v1210_v52  ;;  %1250 = vmatprep.mubr.bf16.mxu0 %v1620_v6 }
  0xce   : > { %1543 = vmatmul.mubr.msk.bf16.vlgmr.msra.gmra.mrb[32].mxu1 %vm239_vm3, %v1464_v53 }
  0xd1   : > { %1466 = vmatmul.mubr.msk.bf16.vlgmr.msra.gmra.mrb[32].mxu0 %vm239_vm3, %v1464_v53 }
 0x161   : > { %v328_v54 = vpop.f32.mrb[0].mxu1 }
 0x162   : > { %v1496_v55 = vpop.f32.mrb[1].mxu1 }
 0x163   : > { %v331_v56 = vpop.f32.mrb[2].mxu1 }
 0x164   : > { %v287_v57 = vpop.f32.mrb[0].mxu0  ;;  %v1497_v58 = vpop.f32.mrb[3].mxu1 }
 0x165   : > { %v289_v59 = vpop.f32.mrb[1].mxu0 }
 0x166   : > { %v291_v3 = vpop.f32.mrb[2].mxu0 }
 0x167   : > { %v292_v60 = vpop.f32.mrb[3].mxu0 }
 0x169   : > { %v421_v61 = vpop.f32.mrb[4].mxu1 }
 0x16a   : > { %v422_v62 = vadd.f32 %v421_v61, %v328_v54  ;;  %v1502_v63 = vpop.f32.mrb[5].mxu1 }
 0x16b   : > { %v424_v6 = vpop.f32.mrb[6].mxu1 }
 0x16c   : > { %v380_v0 = vpop.f32.mrb[4].mxu0  ;;  %v1503_v1 = vpop.f32.mrb[7].mxu1 }
 0x16d   : > { %v381_v2 = vadd.f32 %v380_v0, %v287_v57  ;;  %v382_v4 = vpop.f32.mrb[5].mxu0 }
 0x16e   : > { %v383_v5 = vadd.f32 %v382_v4, %v289_v59  ;;  %v384_v7 = vpop.f32.mrb[6].mxu0 }
 0x16f   : > { %v385_v8 = vpop.f32.mrb[7].mxu0 }
 0x171   : > { %v543_v9 = vpop.f32.mrb[8].mxu1 }
 0x172   : > { %v551_v10 = vadd.f32 %v543_v9, %v422_v62  ;;  %v1508_v11 = vpop.f32.mrb[9].mxu1 }
 0x173   : > { %v546_v12 = vpop.f32.mrb[10].mxu1 }
 0x174   : > { %v502_v13 = vpop.f32.mrb[8].mxu0  ;;  %v1509_v14 = vpop.f32.mrb[11].mxu1 }
 0x175   : > { %v549_v15 = vadd.f32 %v502_v13, %v381_v2  ;;  %v504_v16 = vpop.f32.mrb[9].mxu0  ;;  %v1306_v12 = vpop.permute.xlu0 %1305 }
 0x176   : > { %v550_v17 = vadd.f32 %v504_v16, %v383_v5  ;;  %v506_v18 = vpop.f32.mrb[10].mxu0 }
 0x177   : > { %v507_v19 = vpop.f32.mrb[11].mxu0 }
 0x179   : > { %v668_v20 = vpop.f32.mrb[12].mxu1 }
 0x17a   : > { %v676_v21 = vadd.f32 %v668_v20, %v551_v10  ;;  %v1514_v22 = vpop.f32.mrb[13].mxu1 }
 0x17b   : > { %v671_v23 = vpop.f32.mrb[14].mxu1 }
 0x17c   : > { %v627_v24 = vpop.f32.mrb[12].mxu0  ;;  %v1515_v25 = vpop.f32.mrb[15].mxu1 }
 0x17d   : > { %v674_v26 = vadd.f32 %v627_v24, %v549_v15  ;;  %v629_v27 = vpop.f32.mrb[13].mxu0 }
 0x17e   : > { %v675_v28 = vadd.f32 %v629_v27, %v550_v17  ;;  %v631_v29 = vpop.f32.mrb[14].mxu0 }
 0x17f   : > { %v632_v30 = vpop.f32.mrb[15].mxu0 }
 0x181   : > { %v793_v31 = vpop.f32.mrb[16].mxu1 }
 0x182   : > { %v801_v32 = vadd.f32 %v793_v31, %v676_v21  ;;  %v1520_v33 = vpop.f32.mrb[17].mxu1 }
 0x183   : > { %v796_v34 = vpop.f32.mrb[18].mxu1 }
 0x184   : > { %v752_v35 = vpop.f32.mrb[16].mxu0  ;;  %v1521_v36 = vpop.f32.mrb[19].mxu1 }
 0x185   : > { %v799_v37 = vadd.f32 %v752_v35, %v674_v26  ;;  %v754_v38 = vpop.f32.mrb[17].mxu0 }
 0x186   : > { %v800_v39 = vadd.f32 %v754_v38, %v675_v28  ;;  %v756_v40 = vpop.f32.mrb[18].mxu0 }
 0x187   : > { %v757_v41 = vpop.f32.mrb[19].mxu0 }
 0x189   : > { %v918_v42 = vpop.f32.mrb[20].mxu1 }
 0x18a   : > { %v926_v43 = vadd.f32 %v918_v42, %v801_v32  ;;  %v1526_v44 = vpop.f32.mrb[21].mxu1 }
 0x18b   : > { %v921_v45 = vpop.f32.mrb[22].mxu1 }
 0x18c   : > { %v877_v46 = vpop.f32.mrb[20].mxu0  ;;  %v1527_v47 = vpop.f32.mrb[23].mxu1 }
 0x18d   : > { %v924_v48 = vadd.f32 %v877_v46, %v799_v37  ;;  %v879_v49 = vpop.f32.mrb[21].mxu0 }
 0x18e   : > { %v925_v50 = vadd.f32 %v879_v49, %v800_v39  ;;  %v881_v51 = vpop.f32.mrb[22].mxu0 }
 0x18f   : > { %v882_v52 = vpop.f32.mrb[23].mxu0 }
 0x191   : > { %v1043_v53 = vpop.f32.mrb[24].mxu1 }
 0x192   : > { %v1051_v54 = vadd.f32 %v1043_v53, %v926_v43  ;;  %v1532_v55 = vpop.f32.mrb[25].mxu1 }
 0x193   : > { %v1046_v56 = vpop.f32.mrb[26].mxu1 }
 0x194   : > { %v1002_v57 = vpop.f32.mrb[24].mxu0  ;;  %v1533_v58 = vpop.f32.mrb[27].mxu1 }
 0x195   : > { %v1049_v59 = vadd.f32 %v1002_v57, %v924_v48  ;;  %v1004_v3 = vpop.f32.mrb[25].mxu0 }
 0x196   : > { %v1050_v60 = vadd.f32 %v1004_v3, %v925_v50  ;;  %v1006_v61 = vpop.f32.mrb[26].mxu0 }
 0x197   : > { %v1007_v62 = vpop.f32.mrb[27].mxu0 }
 0x199   : > { %v1168_v63 = vpop.f32.mrb[28].mxu1 }
 0x19a   : > { %v1176_v6 = vadd.f32 %v1168_v63, %v1051_v54  ;;  %v1538_v0 = vpop.f32.mrb[29].mxu1 }
 0x19b   : > { %v1171_v1 = vpop.f32.mrb[30].mxu1 }
 0x19c   : > { %v1127_v2 = vpop.f32.mrb[28].mxu0  ;;  %v1539_v4 = vpop.f32.mrb[31].mxu1 }
 0x19d   : > { %v1174_v5 = vadd.f32 %v1127_v2, %v1049_v59  ;;  %v1129_v7 = vpop.f32.mrb[29].mxu0 }
 0x19e   : > { %v1175_v8 = vadd.f32 %v1129_v7, %v1050_v60  ;;  %v1131_v9 = vpop.f32.mrb[30].mxu0 }
 0x19f   : > { %v1132_v10 = vpop.f32.mrb[31].mxu0 }
 0x1a1   : > { %v1293_v11 = vpop.f32.mrb[32].mxu1 }
 0x1a2   : > { %v1301_v13 = vadd.f32 %v1293_v11, %v1176_v6  ;;  %v1544_v14 = vpop.f32.mrb[33].mxu1 }
 0x1a3   : > { %v1296_v15 = vpop.f32.mrb[34].mxu1 }
 0x1a4   : > { %v1310_v16 = vadd.f32 %v1306_v12, %v1301_v13  ;;  %v1252_v17 = vpop.f32.mrb[32].mxu0  ;;  %v1545_v18 = vpop.f32.mrb[35].mxu1 }
 0x1a5   : > { %v1299_v19 = vadd.f32 %v1252_v17, %v1174_v5  ;;  %v1254_v20 = vpop.f32.mrb[33].mxu0 }
 0x1a6   : > { %vm1313_vm11 = vcmp.ge.f32.partialorder %v1310_v16, 0.0  ;;  %v1316_v21 = vmul.f32 0.2, %v1310_v16  ;;  %v1300_v22 = vadd.f32 %v1254_v20, %v1175_v8  ;;  %v1256_v23 = vpop.f32.mrb[34].mxu0 }
 0x1a7   : > { %v1308_v24 = vadd.f32 %v1306_v12, %v1299_v19  ;;  %v1257_v25 = vpop.f32.mrb[35].mxu0 }
 0x1a8   : > { %v1319_v26 = vsel %vm1313_vm11, %v1310_v16, %v1316_v21  ;;  %v1309_v27 = vadd.f32 %v1306_v12, %v1300_v22 }
 0x1a9   : > { %v1473_v28 = vpack.c.bf16 %v1319_v26, %v1319_v26  ;;  %vm1311_vm13 = vcmp.ge.f32.partialorder %v1308_v24, 0.0  ;;  %v1314_v29 = vmul.f32 0.2, %v1308_v24 }
 0x1aa   : > { %vm1312_vm14 = vcmp.ge.f32.partialorder %v1309_v27, 0.0  ;;  %v1315_v30 = vmul.f32 0.2, %v1309_v27 }
 0x1ab   : > { %1335 = vst.msk [vmem:[%s206_s28 + $0x8] sm:$0xf] %vm1334_vm12, %v1473_v28  ;;  %v1317_v31 = vsel %vm1311_vm13, %v1308_v24, %v1314_v29 }
 0x1ac   : > { %v1318_v32 = vsel %vm1312_vm14, %v1309_v27, %v1315_v30 }
 0x1ad   : > { %v1472_v33 = vpack.c.bf16 %v1318_v32, %v1317_v31 }
 0x1af   : > { %1333 = vst [vmem:[%s206_s28] sm:$0xff] %v1472_v33 }
 0x1b0 PF: > { %s13_s14 = sadd.s32 1, %s1615_s14   ;;  %s1846_s12 = smov %s1611_s13 }
 0x1b1   : > { %p10_p5 = scmp.ge.s32.totalorder %s13_s14, 4   ;;  %s1847_s13 = smov %s1849_s15 }
 0x1b3   :  { %12 = sbr.rel (!%p10_p5) target bundleno = 2 (0x2), region = 70 }

</bundles_post_ra>
